<compile_context>
chip_gen: v6e
topology: v6e:2x2x1
jax: 0.10.0
libtpu: 0.0.40
codegen_flags: <defaults>
</compile_context>

<pallas_src>
import functools

import jax
import jax.numpy as jnp
from jax.experimental import pallas as pl
from jax.experimental.pallas import tpu as pltpu


# ---------------------------------------------------------------------------
# Fused Pallas kernel: 5 GEMMs (bf16 operands, f32 accumulation) with f32
# bias + ReLU epilogues; all weights and activations stay resident in VMEM.
# ---------------------------------------------------------------------------
def _a2c_fused_kernel(x_ref, w1_ref, b1_ref, w2_ref, b2_ref,
                      wh1_ref, bh1_ref, wh2_ref, bh2_ref,
                      wh3_ref, bh3_ref, out_ref):
    # conv1 (folded to a dense GEMM) + bias + ReLU
    h = jnp.dot(x_ref[...], w1_ref[...], preferred_element_type=jnp.float32)
    h = jnp.maximum(h + b1_ref[...], 0.0).astype(jnp.bfloat16)
    # conv2 (folded to a dense GEMM) + bias + ReLU
    co = jnp.dot(h, w2_ref[...], preferred_element_type=jnp.float32)
    co = jnp.maximum(co + b2_ref[...], 0.0).astype(jnp.bfloat16)
    # fused actor|critic layer 1 + ReLU
    h1 = jnp.dot(co, wh1_ref[...], preferred_element_type=jnp.float32)
    h1 = jnp.maximum(h1 + bh1_ref[...], 0.0).astype(jnp.bfloat16)
    # fused actor|critic layer 2 (block-diagonal) + ReLU
    h2 = jnp.dot(h1, wh2_ref[...], preferred_element_type=jnp.float32)
    h2 = jnp.maximum(h2 + bh2_ref[...], 0.0).astype(jnp.bfloat16)
    # actor logits | critic value -> one lane-dense (tm, 128) output slab
    out = jnp.dot(h2, wh3_ref[...], preferred_element_type=jnp.float32)
    out_ref[...] = (out + bh3_ref[...]).astype(out_ref.dtype)


# ---------------------------------------------------------------------------
# Parameter preparation (done once, outside the forward hot path)
# ---------------------------------------------------------------------------
def _round_up(x, m):
    return (x + m - 1) // m * m


def _conv_to_dense(weight, bias, in_chw):
    """Fold a stride-1 VALID Conv2d on a fixed tiny spatial grid into an exact
    dense (Cin*H*W, Cout*OH*OW) matrix; flatten order is NCHW row-major so it
    matches PyTorch's .view(N, -1)."""
    cin, h, w = in_chw
    cout, cin2, kh, kw = weight.shape
    assert cin == cin2
    oh, ow = h - kh + 1, w - kw + 1
    eye = jnp.eye(cin * h * w, dtype=jnp.float32).reshape(cin * h * w, cin, h, w)
    cols = jax.lax.conv_general_dilated(
        eye, weight, window_strides=(1, 1), padding="VALID",
        dimension_numbers=("NCHW", "OIHW", "NCHW"))            # (cin*h*w, cout, oh, ow)
    w_dense = cols.reshape(cin * h * w, cout * oh * ow)
    b_dense = jnp.broadcast_to(bias[:, None, None], (cout, oh, ow)).reshape(1, -1)
    return w_dense, b_dense, (cout, oh, ow)


def prepare_params(params, input_shape, n_actions):
    """Fold convs to dense GEMMs, pad hidden widths to multiples of 128, fuse
    actor/critic heads, and cast matmul operands to bf16 (biases stay f32 for
    the f32 epilogue)."""
    cin, h, w = input_shape
    # Dense-conv folding is only sensible for tiny (2048-style 4x4) boards.
    assert h * w <= 64, "dense-conv folding intended for tiny boards only"

    w1d, b1d, shape1 = _conv_to_dense(params["conv1_w"], params["conv1_b"],
                                      (cin, h, w))
    w2d, b2d, _ = _conv_to_dense(params["conv2_w"], params["conv2_b"], shape1)

    # Pad the conv1 output width (288) up to a multiple of 128 (384) with zero
    # cols of w1/b1 and zero rows of w2: ReLU(0 + 0) = 0, so exact.
    h1w = w1d.shape[1]
    h1w_pad = _round_up(h1w, 128)
    if h1w_pad != h1w:
        w1d = jnp.pad(w1d, ((0, 0), (0, h1w_pad - h1w)))
        b1d = jnp.pad(b1d, ((0, 0), (0, h1w_pad - h1w)))
        w2d = jnp.pad(w2d, ((0, h1w_pad - h1w), (0, 0)))

    h1a, h1c = params["a1_w"].shape[1], params["c1_w"].shape[1]   # 256, 256
    h2a, h2c = params["a2_w"].shape[1], params["c2_w"].shape[1]   # 128, 128

    # Head layer 1: concat actor/critic along N -> one lane-dense GEMM.
    wh1 = jnp.concatenate([params["a1_w"], params["c1_w"]], axis=1)
    bh1 = jnp.concatenate([params["a1_b"], params["c1_b"]])[None, :]

    # Head layer 2: block-diagonal (actor lanes 0..h2a-1, critic after).
    wh2 = jnp.zeros((h1a + h1c, h2a + h2c), jnp.float32)
    wh2 = wh2.at[:h1a, :h2a].set(params["a2_w"])
    wh2 = wh2.at[h1a:, h2a:].set(params["c2_w"])
    bh2 = jnp.concatenate([params["a2_b"], params["c2_b"]])[None, :]

    # Head layer 3: lane-dense 128-wide output slab.
    # lanes [0, n_actions) = logits, lane n_actions = value, rest = 0.
    out_lanes = 128
    assert n_actions + 1 <= out_lanes
    wh3 = jnp.zeros((h2a + h2c, out_lanes), jnp.float32)
    wh3 = wh3.at[:h2a, :n_actions].set(params["a3_w"])
    wh3 = wh3.at[h2a:, n_actions:n_actions + 1].set(params["c3_w"])
    bh3 = jnp.zeros((1, out_lanes), jnp.float32)
    bh3 = bh3.at[0, :n_actions].set(params["a3_b"])
    bh3 = bh3.at[0, n_actions:n_actions + 1].set(params["c3_b"])

    bf16 = jnp.bfloat16
    # TODO(synk): on v7x, the head weights (wh1/wh2/wh3) could drop to fp8
    # (f32 accumulation) for the weight-DMA-bound tiny-batch inference path.
    return {"w1": w1d.astype(bf16), "b1": b1d.astype(jnp.float32),
            "w2": w2d.astype(bf16), "b2": b2d.astype(jnp.float32),
            "wh1": wh1.astype(bf16), "bh1": bh1.astype(jnp.float32),
            "wh2": wh2.astype(bf16), "bh2": bh2.astype(jnp.float32),
            "wh3": wh3.astype(bf16), "bh3": bh3.astype(jnp.float32)}


# ---------------------------------------------------------------------------
# Forward pass: one pallas_call, row-tiled grid ("parallel" for megacore).
# ---------------------------------------------------------------------------
_TM_MAX = 1024   # per-tile intermediates ~9 MB, comfortably under the VMEM limit


def _choose_tm(n):
    """Row-tile size.  Tiny batches run as one full-array block (block dims ==
    array dims, so no (8,128) divisibility requirement and no input padding).
    Bigger batches get >= 2 row tiles so the "parallel" grid axis can shard
    across v7x's two TensorCores, capped at _TM_MAX rows."""
    if n <= 256:
        return n
    return min(_TM_MAX, _round_up(-(-n // 2), 8))


@functools.partial(jax.jit, static_argnames=("n_actions", "return_slab"))
def a2c_forward(prep, x, *, n_actions, return_slab=False):
    n = x.shape[0]
    xflat = x.reshape(n, -1).astype(jnp.bfloat16)   # NCHW .view(N, -1) order
    k_in = xflat.shape[1]

    tm = _choose_tm(n)
    grid = pl.cdiv(n, tm)       # partial last block is masked by Pallas; no jnp.pad
    out_lanes = prep["wh3"].shape[1]

    weights = (prep["w1"], prep["b1"], prep["w2"], prep["b2"],
               prep["wh1"], prep["bh1"], prep["wh2"], prep["bh2"],
               prep["wh3"], prep["bh3"])

    # Weights/biases: constant block index -> fetched once, resident in VMEM
    # across all row tiles.
    # TODO(synk): mark the constant weight specs pipeline_mode=pl.Buffered(1)
    # if single-buffering is ever needed for VMEM headroom (~1.7 MB saved).
    in_specs = [pl.BlockSpec((tm, k_in), lambda i: (i, 0))]
    in_specs += [pl.BlockSpec(wgt.shape, lambda i: (0, 0)) for wgt in weights]

    out = pl.pallas_call(
        _a2c_fused_kernel,
        out_shape=jax.ShapeDtypeStruct((n, out_lanes), jnp.float32),
        grid_spec=pltpu.PrefetchScalarGridSpec(
            num_scalar_prefetch=0,
            grid=(grid,),
            in_specs=in_specs,
            out_specs=pl.BlockSpec((tm, out_lanes), lambda i: (i, 0)),
        ),
        compiler_params=pltpu.CompilerParams(
            dimension_semantics=("parallel",),
            vmem_limit_bytes=40 * 1024 * 1024),
    )(xflat, *weights)

    if return_slab:
        # Latency path for tiny RL rollouts: consumer slices lanes
        # [0, n_actions) (logits) and lane n_actions (value) itself.
        return out
    logits = out[:, :n_actions]
    value = out[:, n_actions:n_actions + 1]
    return logits, value


# ---------------------------------------------------------------------------
# Parameter construction (deterministic, PyTorch-like shapes)
# ---------------------------------------------------------------------------
def init_params(key, in_channels, h, w, n_actions):
    ks = list(jax.random.split(key, 16))

    def nrm(k, shape, scale=0.05):
        return (scale * jax.random.normal(k, shape)).astype(jnp.float32)

    params = {}
    params["conv1_w"] = nrm(ks[0], (32, in_channels, 2, 2))
    params["conv1_b"] = nrm(ks[1], (32,))
    params["conv2_w"] = nrm(ks[2], (64, 32, 2, 2))
    params["conv2_b"] = nrm(ks[3], (64,))
    conv_out = 64 * (h - 2) * (w - 2)
    params["a1_w"] = nrm(ks[4], (conv_out, 256))
    params["a1_b"] = nrm(ks[5], (256,))
    params["a2_w"] = nrm(ks[6], (256, 128))
    params["a2_b"] = nrm(ks[7], (128,))
    params["a3_w"] = nrm(ks[8], (128, n_actions))
    params["a3_b"] = nrm(ks[9], (n_actions,))
    params["c1_w"] = nrm(ks[10], (conv_out, 256))
    params["c1_b"] = nrm(ks[11], (256,))
    params["c2_w"] = nrm(ks[12], (256, 128))
    params["c2_b"] = nrm(ks[13], (128,))
    params["c3_w"] = nrm(ks[14], (128, 1))
    params["c3_b"] = nrm(ks[15], (1,))
    return params


# Pure-JAX f32 reference (mirrors the PyTorch module) for sanity checks.
def a2c_reference(params, x):
    def conv(x, w, b):
        y = jax.lax.conv_general_dilated(
            x, w, window_strides=(1, 1), padding="VALID",
            dimension_numbers=("NCHW", "OIHW", "NCHW"))
        return jnp.maximum(y + b[None, :, None, None], 0.0)

    h = conv(x, params["conv1_w"], params["conv1_b"])
    h = conv(h, params["conv2_w"], params["conv2_b"])
    co = h.reshape(x.shape[0], -1)
    a = jnp.maximum(co @ params["a1_w"] + params["a1_b"], 0.0)
    a = jnp.maximum(a @ params["a2_w"] + params["a2_b"], 0.0)
    logits = a @ params["a3_w"] + params["a3_b"]
    c = jnp.maximum(co @ params["c1_w"] + params["c1_b"], 0.0)
    c = jnp.maximum(c @ params["c2_w"] + params["c2_b"], 0.0)
    value = c @ params["c3_w"] + params["c3_b"]
    return logits, value


if __name__ == "__main__":
    key = jax.random.PRNGKey(0)
    k_x, k_p, k_xb = jax.random.split(key, 3)

    in_channels, H, W = 4, 4, 4            # 2048 board: 4x4, 4 actions
    n_actions = 4

    params = init_params(k_p, in_channels, H, W, n_actions)
    prep = prepare_params(params, (in_channels, H, W), n_actions)

    # bf16 matmul operands -> compare against the f32 reference with relaxed
    # tolerances (values are O(0.05-0.3); bf16 error is O(1e-3)).
    ATOL, RTOL = 2e-2, 2e-2

    # Tiny RL-inference batch: single full-array block, grid = 1.
    x = jax.random.normal(k_x, (2, in_channels, H, W), dtype=jnp.float32)
    logits, value = a2c_forward(prep, x, n_actions=n_actions)
    logits = jax.block_until_ready(logits)
    value = jax.block_until_ready(value)
    ref_logits, ref_value = a2c_reference(params, x)
    assert logits.shape == (2, n_actions) and value.shape == (2, 1)
    assert jnp.allclose(logits, ref_logits, atol=ATOL, rtol=RTOL)
    assert jnp.allclose(value, ref_value, atol=ATOL, rtol=RTOL)

    # Larger training batch: exercises the 2-tile "parallel" grid with a
    # masked partial last block (no jnp.pad of the input).
    xb = jax.random.normal(k_xb, (300, in_channels, H, W), dtype=jnp.float32)
    logits_b, value_b = a2c_forward(prep, xb, n_actions=n_actions)
    logits_b = jax.block_until_ready(logits_b)
    value_b = jax.block_until_ready(value_b)
    ref_logits_b, ref_value_b = a2c_reference(params, xb)
    assert logits_b.shape == (300, n_actions) and value_b.shape == (300, 1)
    assert jnp.allclose(logits_b, ref_logits_b, atol=ATOL, rtol=RTOL)
    assert jnp.allclose(value_b, ref_value_b, atol=ATOL, rtol=RTOL)

    print("KERNEL_OK")
</pallas_src>

<mosaic_0001>
module attributes {stable_mosaic.version = 11 : i64} {
  func.func @_a2c_fused_kernel(%arg0: i32, %arg1: memref<2x64xbf16, #tpu.memory_space<vmem>>, %arg2: memref<64x384xbf16, #tpu.memory_space<vmem>>, %arg3: memref<1x384xf32, #tpu.memory_space<vmem>>, %arg4: memref<384x256xbf16, #tpu.memory_space<vmem>>, %arg5: memref<1x256xf32, #tpu.memory_space<vmem>>, %arg6: memref<256x512xbf16, #tpu.memory_space<vmem>>, %arg7: memref<1x512xf32, #tpu.memory_space<vmem>>, %arg8: memref<512x256xbf16, #tpu.memory_space<vmem>>, %arg9: memref<1x256xf32, #tpu.memory_space<vmem>>, %arg10: memref<256x128xbf16, #tpu.memory_space<vmem>>, %arg11: memref<1x128xf32, #tpu.memory_space<vmem>>, %arg12: memref<2x128xf32, #tpu.memory_space<vmem>>) attributes {dimension_semantics = [#tpu.dimension_semantics<parallel>], iteration_bounds = array<i64: 1>, scalar_prefetch = 0 : i64, scratch_operands = 0 : i64, tpu.core_type = #tpu.core_type<tc>, window_params = [{transform_indices = @transform_0, window_bounds = array<i64: 2, 64>}, {pipeline_mode = #tpu.pipeline_mode<synchronous>, transform_indices = @transform_1, window_bounds = array<i64: 64, 384>}, {pipeline_mode = #tpu.pipeline_mode<synchronous>, transform_indices = @transform_2, window_bounds = array<i64: 1, 384>}, {pipeline_mode = #tpu.pipeline_mode<synchronous>, transform_indices = @transform_3, window_bounds = array<i64: 384, 256>}, {pipeline_mode = #tpu.pipeline_mode<synchronous>, transform_indices = @transform_4, window_bounds = array<i64: 1, 256>}, {pipeline_mode = #tpu.pipeline_mode<synchronous>, transform_indices = @transform_5, window_bounds = array<i64: 256, 512>}, {pipeline_mode = #tpu.pipeline_mode<synchronous>, transform_indices = @transform_6, window_bounds = array<i64: 1, 512>}, {pipeline_mode = #tpu.pipeline_mode<synchronous>, transform_indices = @transform_7, window_bounds = array<i64: 512, 256>}, {pipeline_mode = #tpu.pipeline_mode<synchronous>, transform_indices = @transform_8, window_bounds = array<i64: 1, 256>}, {pipeline_mode = #tpu.pipeline_mode<synchronous>, transform_indices = @transform_9, window_bounds = array<i64: 256, 128>}, {pipeline_mode = #tpu.pipeline_mode<synchronous>, transform_indices = @transform_10, window_bounds = array<i64: 1, 128>}, {transform_indices = @transform_11, window_bounds = array<i64: 2, 128>}]} {
    %c0 = arith.constant 0 : index
    %c0_0 = arith.constant 0 : index
    %0 = vector.load %arg1[%c0, %c0_0] : memref<2x64xbf16, #tpu.memory_space<vmem>>, vector<2x64xbf16>
    %c0_1 = arith.constant 0 : index
    %c0_2 = arith.constant 0 : index
    %1 = vector.load %arg2[%c0_1, %c0_2] : memref<64x384xbf16, #tpu.memory_space<vmem>>, vector<64x384xbf16>
    %cst = arith.constant dense<0.000000e+00> : vector<2x384xf32>
    %2 = tpu.matmul %0, %1, %cst {dimension_numbers = #tpu.dot_dimension_numbers<[1], [0], [0], [1], [0, 0, 1, 1], [], []>} : vector<2x64xbf16>, vector<64x384xbf16>, vector<2x384xf32> -> vector<2x384xf32>
    %c0_3 = arith.constant 0 : index
    %c0_4 = arith.constant 0 : index
    %3 = vector.load %arg3[%c0_3, %c0_4] : memref<1x384xf32, #tpu.memory_space<vmem>>, vector<1x384xf32>
    %4 = vector.broadcast %3 : vector<1x384xf32> to vector<2x384xf32>
    %5 = arith.addf %2, %4 : vector<2x384xf32>
    %cst_5 = arith.constant 0.000000e+00 : f32
    %6 = vector.broadcast %cst_5 : f32 to vector<2x384xf32>
    %7 = arith.maximumf %5, %6 : vector<2x384xf32>
    %8 = arith.truncf %7 : vector<2x384xf32> to vector<2x384xbf16>
    %c0_6 = arith.constant 0 : index
    %c0_7 = arith.constant 0 : index
    %9 = vector.load %arg4[%c0_6, %c0_7] : memref<384x256xbf16, #tpu.memory_space<vmem>>, vector<384x256xbf16>
    %cst_8 = arith.constant dense<0.000000e+00> : vector<2x256xf32>
    %10 = tpu.matmul %8, %9, %cst_8 {dimension_numbers = #tpu.dot_dimension_numbers<[1], [0], [0], [1], [0, 0, 1, 1], [], []>} : vector<2x384xbf16>, vector<384x256xbf16>, vector<2x256xf32> -> vector<2x256xf32>
    %c0_9 = arith.constant 0 : index
    %c0_10 = arith.constant 0 : index
    %11 = vector.load %arg5[%c0_9, %c0_10] : memref<1x256xf32, #tpu.memory_space<vmem>>, vector<1x256xf32>
    %12 = vector.broadcast %11 : vector<1x256xf32> to vector<2x256xf32>
    %13 = arith.addf %10, %12 : vector<2x256xf32>
    %cst_11 = arith.constant 0.000000e+00 : f32
    %14 = vector.broadcast %cst_11 : f32 to vector<2x256xf32>
    %15 = arith.maximumf %13, %14 : vector<2x256xf32>
    %16 = arith.truncf %15 : vector<2x256xf32> to vector<2x256xbf16>
    %c0_12 = arith.constant 0 : index
    %c0_13 = arith.constant 0 : index
    %17 = vector.load %arg6[%c0_12, %c0_13] : memref<256x512xbf16, #tpu.memory_space<vmem>>, vector<256x512xbf16>
    %cst_14 = arith.constant dense<0.000000e+00> : vector<2x512xf32>
    %18 = tpu.matmul %16, %17, %cst_14 {dimension_numbers = #tpu.dot_dimension_numbers<[1], [0], [0], [1], [0, 0, 1, 1], [], []>} : vector<2x256xbf16>, vector<256x512xbf16>, vector<2x512xf32> -> vector<2x512xf32>
    %c0_15 = arith.constant 0 : index
    %c0_16 = arith.constant 0 : index
    %19 = vector.load %arg7[%c0_15, %c0_16] : memref<1x512xf32, #tpu.memory_space<vmem>>, vector<1x512xf32>
    %20 = vector.broadcast %19 : vector<1x512xf32> to vector<2x512xf32>
    %21 = arith.addf %18, %20 : vector<2x512xf32>
    %cst_17 = arith.constant 0.000000e+00 : f32
    %22 = vector.broadcast %cst_17 : f32 to vector<2x512xf32>
    %23 = arith.maximumf %21, %22 : vector<2x512xf32>
    %24 = arith.truncf %23 : vector<2x512xf32> to vector<2x512xbf16>
    %c0_18 = arith.constant 0 : index
    %c0_19 = arith.constant 0 : index
    %25 = vector.load %arg8[%c0_18, %c0_19] : memref<512x256xbf16, #tpu.memory_space<vmem>>, vector<512x256xbf16>
    %cst_20 = arith.constant dense<0.000000e+00> : vector<2x256xf32>
    %26 = tpu.matmul %24, %25, %cst_20 {dimension_numbers = #tpu.dot_dimension_numbers<[1], [0], [0], [1], [0, 0, 1, 1], [], []>} : vector<2x512xbf16>, vector<512x256xbf16>, vector<2x256xf32> -> vector<2x256xf32>
    %c0_21 = arith.constant 0 : index
    %c0_22 = arith.constant 0 : index
    %27 = vector.load %arg9[%c0_21, %c0_22] : memref<1x256xf32, #tpu.memory_space<vmem>>, vector<1x256xf32>
    %28 = vector.broadcast %27 : vector<1x256xf32> to vector<2x256xf32>
    %29 = arith.addf %26, %28 : vector<2x256xf32>
    %cst_23 = arith.constant 0.000000e+00 : f32
    %30 = vector.broadcast %cst_23 : f32 to vector<2x256xf32>
    %31 = arith.maximumf %29, %30 : vector<2x256xf32>
    %32 = arith.truncf %31 : vector<2x256xf32> to vector<2x256xbf16>
    %c0_24 = arith.constant 0 : index
    %c0_25 = arith.constant 0 : index
    %33 = vector.load %arg10[%c0_24, %c0_25] : memref<256x128xbf16, #tpu.memory_space<vmem>>, vector<256x128xbf16>
    %cst_26 = arith.constant dense<0.000000e+00> : vector<2x128xf32>
    %34 = tpu.matmul %32, %33, %cst_26 {dimension_numbers = #tpu.dot_dimension_numbers<[1], [0], [0], [1], [0, 0, 1, 1], [], []>} : vector<2x256xbf16>, vector<256x128xbf16>, vector<2x128xf32> -> vector<2x128xf32>
    %c0_27 = arith.constant 0 : index
    %c0_28 = arith.constant 0 : index
    %35 = vector.load %arg11[%c0_27, %c0_28] : memref<1x128xf32, #tpu.memory_space<vmem>>, vector<1x128xf32>
    %36 = vector.broadcast %35 : vector<1x128xf32> to vector<2x128xf32>
    %37 = arith.addf %34, %36 : vector<2x128xf32>
    %c0_29 = arith.constant 0 : index
    %c0_30 = arith.constant 0 : index
    %38 = vector.load %arg12[%c0_29, %c0_30] : memref<2x128xf32, #tpu.memory_space<vmem>>, vector<2x128xf32>
    tpu.vector_store %arg12[%c0_29, %c0_30], %37 {strides = array<i32>} : memref<2x128xf32, #tpu.memory_space<vmem>>, vector<2x128xf32>,
    return
  }
  func.func @transform_0(%arg0: i32) -> (i32, i32) {
    %c0_i32 = arith.constant 0 : i32
    %c0_i32_0 = arith.constant 0 : i32
    return %arg0, %c0_i32 : i32, i32
  }
  func.func @transform_1(%arg0: i32) -> (i32, i32) {
    %c0_i32 = arith.constant 0 : i32
    %c0_i32_0 = arith.constant 0 : i32
    %c0_i32_1 = arith.constant 0 : i32
    return %c0_i32, %c0_i32_0 : i32, i32
  }
  func.func @transform_2(%arg0: i32) -> (i32, i32) {
    %c0_i32 = arith.constant 0 : i32
    %c0_i32_0 = arith.constant 0 : i32
    %c0_i32_1 = arith.constant 0 : i32
    return %c0_i32, %c0_i32_0 : i32, i32
  }
  func.func @transform_3(%arg0: i32) -> (i32, i32) {
    %c0_i32 = arith.constant 0 : i32
    %c0_i32_0 = arith.constant 0 : i32
    %c0_i32_1 = arith.constant 0 : i32
    return %c0_i32, %c0_i32_0 : i32, i32
  }
  func.func @transform_4(%arg0: i32) -> (i32, i32) {
    %c0_i32 = arith.constant 0 : i32
    %c0_i32_0 = arith.constant 0 : i32
    %c0_i32_1 = arith.constant 0 : i32
    return %c0_i32, %c0_i32_0 : i32, i32
  }
  func.func @transform_5(%arg0: i32) -> (i32, i32) {
    %c0_i32 = arith.constant 0 : i32
    %c0_i32_0 = arith.constant 0 : i32
    %c0_i32_1 = arith.constant 0 : i32
    return %c0_i32, %c0_i32_0 : i32, i32
  }
  func.func @transform_6(%arg0: i32) -> (i32, i32) {
    %c0_i32 = arith.constant 0 : i32
    %c0_i32_0 = arith.constant 0 : i32
    %c0_i32_1 = arith.constant 0 : i32
    return %c0_i32, %c0_i32_0 : i32, i32
  }
  func.func @transform_7(%arg0: i32) -> (i32, i32) {
    %c0_i32 = arith.constant 0 : i32
    %c0_i32_0 = arith.constant 0 : i32
    %c0_i32_1 = arith.constant 0 : i32
    return %c0_i32, %c0_i32_0 : i32, i32
  }
  func.func @transform_8(%arg0: i32) -> (i32, i32) {
    %c0_i32 = arith.constant 0 : i32
    %c0_i32_0 = arith.constant 0 : i32
    %c0_i32_1 = arith.constant 0 : i32
    return %c0_i32, %c0_i32_0 : i32, i32
  }
  func.func @transform_9(%arg0: i32) -> (i32, i32) {
    %c0_i32 = arith.constant 0 : i32
    %c0_i32_0 = arith.constant 0 : i32
    %c0_i32_1 = arith.constant 0 : i32
    return %c0_i32, %c0_i32_0 : i32, i32
  }
  func.func @transform_10(%arg0: i32) -> (i32, i32) {
    %c0_i32 = arith.constant 0 : i32
    %c0_i32_0 = arith.constant 0 : i32
    %c0_i32_1 = arith.constant 0 : i32
    return %c0_i32, %c0_i32_0 : i32, i32
  }
  func.func @transform_11(%arg0: i32) -> (i32, i32) {
    %c0_i32 = arith.constant 0 : i32
    %c0_i32_0 = arith.constant 0 : i32
    return %arg0, %c0_i32 : i32, i32
  }
}

</mosaic_0001>

<bundles_post_ra>
// kernel: a2c_forward.1
= control target key start
LH: loop header
LB: loop body
LE: loop exit
PB: predicated region body
PF: predicated region fallthrough
CT: control target
= control target key end

     0   :  { %16 = vsyncpa [#allocation3], 0  ;;  %s2641_s0 = inlined_call_operand.vmem [shape: bf16[2,64], index: 0, kind: input, shape index: {}]   ;;  %s2642_s1 = inlined_call_operand.hbm [shape: bf16[64,384], index: 1, kind: input, shape index: {}]   ;;  %s2643_s2 = inlined_call_operand.vmem [shape: f32[1,384], index: 2, kind: input, shape index: {}]   ;;  %s2644_s3 = inlined_call_operand.hbm [shape: bf16[384,256], index: 3, kind: input, shape index: {}]   ;;  %s2645_s4 = inlined_call_operand.vmem [shape: f32[1,256], index: 4, kind: input, shape index: {}]   ;;  %s2646_s5 = inlined_call_operand.hbm [shape: bf16[256,512], index: 5, kind: input, shape index: {}]   ;;  %s2647_s6 = inlined_call_operand.vmem [shape: f32[1,512], index: 6, kind: input, shape index: {}]   ;;  %s2648_s7 = inlined_call_operand.hbm [shape: bf16[512,256], index: 7, kind: input, shape index: {}]   ;;  %s2649_s8 = inlined_call_operand.vmem [shape: f32[1,256], index: 8, kind: input, shape index: {}]   ;;  %s2650_s9 = inlined_call_operand.hbm [shape: bf16[256,128], index: 9, kind: input, shape index: {}]   ;;  %s2651_s10 = inlined_call_operand.vmem [shape: f32[1,128], index: 10, kind: input, shape index: {}]   ;;  %s2652_s11 = inlined_call_operand.vmem [shape: f32[2,128], index: 11, kind: output, shape index: {}]  }
   0x1   :  { %17 = vsyncpa [#allocation5], 0 }
   0x2   :  { %18 = vsyncpa [#allocation8], 0  ;;  %s2507_s17 = smov [#allocation4]  }
   0x3   :  { %s40_s18 = sshll.u32 %s2507_s17, 4  ;;  %s41_s18 = int_to_ptr.vmem [resolvable:$true] %s40_s18 }
   0x4   :  { %s2409_s19 = scalar_lea.vmem %s41_s18, 6144  ;;  %p2414_p1 = scmp.lt.s32.totalorder %s41_s18, %s41_s18 }
   0x5   :  { %p2410_p0 = scmp.ne.s32.totalorder %s41_s18, %s2409_s19  ;;  %p2415_p2 = scmp.lt.s32.totalorder %s2409_s19, %s2409_s19 }
   0x7   :  { %p2416_p3 = por %p2415_p2, %p2414_p1 }
   0x9   :  { %p2417_p4 = pnand %p2416_p3, %p2410_p0 }
   0xb   :  { %2420 = shalt.err (!%p2417_p4)
}
   0xc   :  { %s2508_s20 = smov 128   ;;  %s2509_s21 = smov 8  }
   0xd   :  { %46 = dma.hbm_to_vmem [thread:$0]  %s2644_s3, 6144, %s41_s18, [#allocation5], %s2508_s20, %s2508_s20, %s2509_s21  }
   0xe   :  { %s2510_s24 = smov [#allocation7]   ;;  %s2511_s26 = smov [#allocation2]  }
   0xf   :  { %s68_s25 = sshll.u32 %s2510_s24, 4  ;;  %s26_s27 = sshll.u32 %s2511_s26, 4  ;;  %s69_s25 = int_to_ptr.vmem [resolvable:$true] %s68_s25  ;;  %s27_s27 = int_to_ptr.vmem [resolvable:$true] %s26_s27 }
  0x10   :  { %s2429_s28 = scalar_lea.vmem %s69_s25, 8192  ;;  %p2434_p6 = scmp.lt.s32.totalorder %s69_s25, %s69_s25 }
  0x11   :  { %p2430_p5 = scmp.ne.s32.totalorder %s69_s25, %s2429_s28  ;;  %p2435_p7 = scmp.lt.s32.totalorder %s2429_s28, %s2429_s28 }
  0x13   :  { %p2436_p8 = por %p2435_p7, %p2434_p6 }
  0x15   :  { %p2437_p9 = pnand %p2436_p8, %p2430_p5 }
  0x17   :  { %2440 = shalt.err (!%p2437_p9)
}
  0x18   :  { %74 = dma.hbm_to_vmem [thread:$0]  %s2648_s7, 8192, %s69_s25, [#allocation8], %s2508_s20, %s2508_s20, %s2509_s21  }
  0x19   :  { %s2449_s12 = scalar_lea.vmem %s27_s27, 1536  ;;  %p2454_p11 = scmp.lt.s32.totalorder %s27_s27, %s27_s27 }
  0x1a   :  { %p2450_p10 = scmp.ne.s32.totalorder %s27_s27, %s2449_s12  ;;  %p2455_p12 = scmp.lt.s32.totalorder %s2449_s12, %s2449_s12 }
  0x1c   :  { %p2456_p13 = por %p2455_p12, %p2454_p11 }
  0x1e   :  { %p2457_p0 = pnand %p2456_p13, %p2450_p10 }
  0x20   :  { %2460 = shalt.err (!%p2457_p0)
}
  0x21   :  { %s2512_s3 = smov 192   ;;  %s2513_s13 = smov 12  }
  0x22   :  { %32 = dma.hbm_to_vmem [thread:$0]  %s2642_s1, 1536, %s27_s27, [#allocation3], %s2512_s3, %s2512_s3, %s2513_s13  }
  0x23   :  { %s2514_s16 = smov [#allocation6]  }
  0x24   :  { %s54_s17 = sshll.u32 %s2514_s16, 4  ;;  %s55_s17 = int_to_ptr.vmem [resolvable:$true] %s54_s17 }
  0x25   :  { %s2469_s18 = scalar_lea.vmem %s55_s17, 8192  ;;  %p2474_p2 = scmp.lt.s32.totalorder %s55_s17, %s55_s17 }
  0x26   :  { %p2470_p1 = scmp.ne.s32.totalorder %s55_s17, %s2469_s18  ;;  %p2475_p3 = scmp.lt.s32.totalorder %s2469_s18, %s2469_s18 }
  0x28   :  { %p2476_p4 = por %p2475_p3, %p2474_p2 }
  0x2a   :  { %p2477_p5 = pnand %p2476_p4, %p2470_p1 }
  0x2c   :  { %2480 = shalt.err (!%p2477_p5)
}
  0x2d   :  { %s2515_s7 = smov 256   ;;  %s2516_s19 = smov 16  }
  0x2e   :  { %60 = dma.hbm_to_vmem [thread:$0]  %s2646_s5, 8192, %s55_s17, [#allocation5], %s2515_s7, %s2515_s7, %s2516_s19  }
  0x2f   :  { %s2517_s22 = smov [#allocation9]  }
  0x30   :  { %s82_s23 = sshll.u32 %s2517_s22, 4  ;;  %s83_s23 = int_to_ptr.vmem [resolvable:$true] %s82_s23 }
  0x31   :  { %s2489_s1 = scalar_lea.vmem %s83_s23, 2048  ;;  %p2494_p7 = scmp.lt.s32.totalorder %s83_s23, %s83_s23 }
  0x32   :  { %p2490_p6 = scmp.ne.s32.totalorder %s83_s23, %s2489_s1  ;;  %p2495_p8 = scmp.lt.s32.totalorder %s2489_s1, %s2489_s1 }
  0x34   :  { %p2496_p9 = por %p2495_p8, %p2494_p7 }
  0x36   :  { %p2497_p10 = pnand %p2496_p9, %p2490_p6 }
  0x38   :  { %2500 = shalt.err (!%p2497_p10)
}
  0x39   :  { %s2518_s24 = smov 64   ;;  %s2519_s25 = smov 4  }
  0x3a   :  { %88 = dma.hbm_to_vmem [thread:$0]  %s2650_s9, 2048, %s83_s23, [#allocation8], %s2518_s24, %s2518_s24, %s2519_s25  }
  0x3b   :  { %2501 = dma.done.wait [#allocation3], 1536  }
  0x3c   :  { %2502 = vsyncadd [#allocation3], 4294965760 }
  0x3d   :  { %2503 = dma.done.wait [#allocation5], 14336  }
  0x3e   :  { %2504 = vsyncadd [#allocation5], 4294952960 }
  0x3f   :  { %2505 = dma.done.wait [#allocation8], 10240  }
  0x40   :  { %2506 = vsyncadd [#allocation8], 4294957056  ;;  %v2520_v0 = vmov 0.0   ;;  %vm2521_vm0 = vmmov 0   ;;  %v2522_v1 = vmov 0   ;;  %vm205_vm1 = vcmask 523264  }
  0x41   :  { %2077 = vmatprep.subr.bf16.mxu1 %v2520_v0  ;;  %2085 = vmatprep.mubr.msk.bf16.mxu1 %vm2521_vm0, %v2520_v0  ;;  %v2105_v2 = vld [vmem:[#allocation2 + $0x4c] ss:$12 sps:$4 sm:$0xff]   ;;  %v2107_v3 = vld [vmem:[#allocation2 + $0x50] ss:$12 sps:$4 sm:$0xff]   ;;  %v2108_v4 = vld [vmem:[#allocation2 + $0x48] ss:$12 sps:$4 sm:$0xff]  }
  0x42   :  { %241 = vmatprep.mubr.bf16.mxu0 %v2522_v1  ;;  %217 = vmatprep.subr.bf16.mxu0 %v2105_v2  ;;  %v2109_v5 = vld [vmem:[#allocation2 + $0x34] ss:$12 sps:$4 sm:$0xff]   ;;  %v2111_v6 = vld [vmem:[#allocation2 + $0x38] ss:$12 sps:$4 sm:$0xff]   ;;  %v2112_v7 = vld [vmem:[#allocation2 + $0x30] ss:$12 sps:$4 sm:$0xff]  }
  0x43   :  { %2078 = vmatpush3.bf16.msra.mxu1 %v2107_v3  ;;  %218 = vmatpush1.bf16.msra.mxu0 %v2108_v4  ;;  %v2113_v8 = vld [vmem:[#allocation2 + $0x1c] ss:$12 sps:$4 sm:$0xff]   ;;  %v2115_v9 = vld [vmem:[#allocation2 + $0x20] ss:$12 sps:$4 sm:$0xff]   ;;  %v2116_v10 = vld [vmem:[#allocation2 + $0x18] ss:$12 sps:$4 sm:$0xff]  }
  0x44   :  { %2079 = vmatprep.subr.bf16.mxu1 %v2520_v0  ;;  %219 = vmatprep.subr.bf16.mxu0 %v2109_v5  ;;  %v2117_v11 = vld [vmem:[#allocation2 + $0x4] ss:$12 sps:$4 sm:$0xff]   ;;  %v2119_v12 = vld [vmem:[#allocation2 + $0x8] ss:$12 sps:$4 sm:$0xff]   ;;  %v2120_v13 = vld [vmem:[#allocation2] ss:$12 sps:$4 sm:$0xff]  }
  0x45   :  { %v2123_v14 = vld [vmem:[#allocation4 + $0x74] ss:$8 sps:$4 sm:$0xff]   ;;  %v107_v15 = vld [vmem:[%s2641_s0] sm:$0x1]  ;;  %v2121_v16 = vld [vmem:[#allocation4 + $0x70] ss:$8 sps:$4 sm:$0xff]  }
  0x46   :  { %v2126_v17 = vld [vmem:[#allocation4 + $0x64] ss:$8 sps:$4 sm:$0xff]   ;;  %v2124_v18 = vld [vmem:[#allocation4 + $0x60] ss:$8 sps:$4 sm:$0xff]   ;;  %v2129_v19 = vld [vmem:[#allocation4 + $0x54] ss:$8 sps:$4 sm:$0xff]  }
  0x47   :  { %2080 = vmatpush3.bf16.msra.mxu1 %v2111_v6  ;;  %220 = vmatpush1.bf16.msra.mxu0 %v2112_v7  ;;  %v2145_v20 = vld [vmem:[#allocation4 + $0x170] ss:$8 sps:$4 sm:$0xff]   ;;  %v2147_v21 = vld [vmem:[#allocation4 + $0x174] ss:$8 sps:$4 sm:$0xff]   ;;  %v2151_v23 = vld [vmem:[#allocation4 + $0x160] ss:$8 sps:$4 sm:$0xff]  }
  0x48   :  { %2081 = vmatprep.subr.bf16.mxu1 %v2520_v0  ;;  %221 = vmatprep.subr.bf16.mxu0 %v2113_v8  ;;  %v2127_v22 = vld [vmem:[#allocation4 + $0x50] ss:$8 sps:$4 sm:$0xff]   ;;  %v2153_v24 = vld [vmem:[#allocation4 + $0x164] ss:$8 sps:$4 sm:$0xff]   ;;  %v2159_v26 = vld [vmem:[#allocation4 + $0x154] ss:$8 sps:$4 sm:$0xff]  }
  0x49   :  { %v2132_v25 = vld [vmem:[#allocation4 + $0x44] ss:$8 sps:$4 sm:$0xff]   ;;  %v2130_v27 = vld [vmem:[#allocation4 + $0x40] ss:$8 sps:$4 sm:$0xff]   ;;  %v2157_v28 = vld [vmem:[#allocation4 + $0x150] ss:$8 sps:$4 sm:$0xff]  }
  0x4a   :  { %v2135_v29 = vld [vmem:[#allocation4 + $0x34] ss:$8 sps:$4 sm:$0xff]   ;;  %v2165_v30 = vld [vmem:[#allocation4 + $0x144] ss:$8 sps:$4 sm:$0xff]   ;;  %v2133_v31 = vld [vmem:[#allocation4 + $0x30] ss:$8 sps:$4 sm:$0xff]  }
  0x4b   :  { %2082 = vmatpush3.bf16.msra.mxu1 %v2115_v9  ;;  %222 = vmatpush1.bf16.msra.mxu0 %v2116_v10  ;;  %v2163_v32 = vld [vmem:[#allocation4 + $0x140] ss:$8 sps:$4 sm:$0xff]   ;;  %v2138_v33 = vld [vmem:[#allocation4 + $0x24] ss:$8 sps:$4 sm:$0xff]   ;;  %v2171_v34 = vld [vmem:[#allocation4 + $0x134] ss:$8 sps:$4 sm:$0xff]  }
  0x4c   :  { %2083 = vmatprep.subr.bf16.mxu1 %v2520_v0  ;;  %223 = vmatprep.subr.bf16.mxu0 %v2117_v11  ;;  %v2136_v35 = vld [vmem:[#allocation4 + $0x20] ss:$8 sps:$4 sm:$0xff]   ;;  %v2169_v36 = vld [vmem:[#allocation4 + $0x130] ss:$8 sps:$4 sm:$0xff]   ;;  %v2141_v37 = vld [vmem:[#allocation4 + $0x14] ss:$8 sps:$4 sm:$0xff]  }
  0x4d   :  { %v2177_v38 = vld [vmem:[#allocation4 + $0x124] ss:$8 sps:$4 sm:$0xff]   ;;  %v2139_v39 = vld [vmem:[#allocation4 + $0x10] ss:$8 sps:$4 sm:$0xff]   ;;  %v2175_v40 = vld [vmem:[#allocation4 + $0x120] ss:$8 sps:$4 sm:$0xff]  }
  0x4e   :  { %v2144_v41 = vld [vmem:[#allocation4 + $0x4] ss:$8 sps:$4 sm:$0xff]   ;;  %v2183_v42 = vld [vmem:[#allocation4 + $0x114] ss:$8 sps:$4 sm:$0xff]   ;;  %v2142_v43 = vld [vmem:[#allocation4] ss:$8 sps:$4 sm:$0xff]  }
  0x4f   :  { %2084 = vmatpush3.bf16.msra.mxu1 %v2119_v12  ;;  %224 = vmatpush1.bf16.msra.mxu0 %v2120_v13  ;;  %v2181_v44 = vld [vmem:[#allocation4 + $0x110] ss:$8 sps:$4 sm:$0xff]   ;;  %v2150_v45 = vld [vmem:[#allocation4 + $0xf4] ss:$8 sps:$4 sm:$0xff]   ;;  %v2156_v47 = vld [vmem:[#allocation4 + $0xe4] ss:$8 sps:$4 sm:$0xff]  }
  0x50   :  { %596 = vmatprep.subr.bf16.mxu0 %v2123_v14  ;;  %637 = vmatprep.subr.bf16.mxu1 %v2147_v21  ;;  %v2148_v46 = vld [vmem:[#allocation4 + $0xf0] ss:$8 sps:$4 sm:$0xff]   ;;  %v2154_v48 = vld [vmem:[#allocation4 + $0xe0] ss:$8 sps:$4 sm:$0xff]   ;;  %v2162_v49 = vld [vmem:[#allocation4 + $0xd4] ss:$8 sps:$4 sm:$0xff]  }
  0x51   :  { %v2160_v50 = vld [vmem:[#allocation4 + $0xd0] ss:$8 sps:$4 sm:$0xff]   ;;  %v2168_v51 = vld [vmem:[#allocation4 + $0xc4] ss:$8 sps:$4 sm:$0xff]   ;;  %v2166_v52 = vld [vmem:[#allocation4 + $0xc0] ss:$8 sps:$4 sm:$0xff]  }
  0x52   :  { %2086 = vmatmul.mubr.msk.bf16.vlgmr.msra.gmra.mxu1 %vm205_vm1, %v107_v15  ;;  %1855 = vmatmul.mubr.msk.bf16.vlgmr.msra.gmra.mxu0 %vm205_vm1, %v107_v15  ;;  %v2174_v53 = vld [vmem:[#allocation4 + $0xb4] ss:$8 sps:$4 sm:$0xff]   ;;  %v2172_v54 = vld [vmem:[#allocation4 + $0xb0] ss:$8 sps:$4 sm:$0xff]   ;;  %v2180_v55 = vld [vmem:[#allocation4 + $0xa4] ss:$8 sps:$4 sm:$0xff]  }
  0x53   :  { %669 = vmatprep.mubr.bf16.mxu1 %v2522_v1  ;;  %597 = vmatpush1.bf16.msra.mxu0 %v2121_v16  ;;  %v2178_v56 = vld [vmem:[#allocation4 + $0xa0] ss:$8 sps:$4 sm:$0xff]   ;;  %v2186_v57 = vld [vmem:[#allocation4 + $0x94] ss:$8 sps:$4 sm:$0xff]   ;;  %v2189_v58 = vld [vmem:[#allocation4 + $0x104] ss:$8 sps:$4 sm:$0xff]   ;;  %v126_v1 = vlaneseq }
  0x54   :  { %598 = vmatprep.subr.bf16.mxu0 %v2126_v17  ;;  %638 = vmatpush1.bf16.msra.mxu1 %v2145_v20  ;;  %v2184_v59 = vld [vmem:[#allocation4 + $0x90] ss:$8 sps:$4 sm:$0xff]   ;;  %v2187_v60 = vld [vmem:[#allocation4 + $0x100] ss:$8 sps:$4 sm:$0xff]   ;;  %v2192_v61 = vld [vmem:[#allocation4 + $0x84] ss:$8 sps:$4 sm:$0xff]  }
  0x55   :  { %639 = vmatprep.subr.bf16.mxu1 %v2153_v24  ;;  %v2190_v62 = vld [vmem:[#allocation4 + $0x80] ss:$8 sps:$4 sm:$0xff]   ;;  %v2195_v63 = vld [vmem:[#allocation6 + $0xe4] ss:$16 sps:$4 sm:$0xff]   ;;  %v2198_v0 = vld [vmem:[#allocation6 + $0xec] ss:$16 sps:$4 sm:$0xff]  }
  0x56   :  { %v2601_v2 = vshrl.u32 %v126_v1, 7  ;;  %v124_v4 = vld [vmem:[%s2643_s2] sm:$0x7]  ;;  %v2250_v1 = vld [vmem:[#allocation6 + $0x1c8] ss:$16 sps:$4 sm:$0xff]  }
  0x57   :  { %599 = vmatpush1.bf16.msra.mxu0 %v2124_v18 }
  0x58   :  { %600 = vmatprep.subr.bf16.mxu0 %v2129_v19  ;;  %640 = vmatpush1.bf16.msra.mxu1 %v2151_v23  ;;  %v136_v3 = vsub.s32 2, %v2601_v2  ;;  %v2608_v5 = vsub.s32 0, %v2601_v2  ;;  %v2611_v6 = vsub.s32 1, %v2601_v2  ;;  %v2193_v19 = vld [vmem:[#allocation6 + $0xe0] ss:$16 sps:$4 sm:$0xff]  }
  0x59   :  { %641 = vmatprep.subr.bf16.mxu1 %v2159_v26  ;;  %v2201_v23 = vld [vmem:[#allocation6 + $0xc4] ss:$16 sps:$4 sm:$0xff]  }
  0x5a   :  { %v137_v7 = vrot.slane %v124_v4, %v136_v3  ;;  %v129_v8 = vrot.slane %v124_v4, %v2608_v5  ;;  %v133_v10 = vrot.slane %v124_v4, %v2611_v6  ;;  %v2253_v4 = vld [vmem:[#allocation6 + $0x1a0] ss:$16 sps:$4 sm:$0xff]  }
  0x5b   :  { %601 = vmatpush1.bf16.msra.mxu0 %v2127_v22 }
  0x5c   :  { %602 = vmatprep.subr.bf16.mxu0 %v2132_v25  ;;  %642 = vmatpush1.bf16.msra.mxu1 %v2157_v28  ;;  %v2196_v28 = vld [vmem:[#allocation6 + $0xe8] ss:$16 sps:$4 sm:$0xff]  }
  0x5d   :  { %643 = vmatprep.subr.bf16.mxu1 %v2165_v30 }
  0x5f   :  { %603 = vmatpush1.bf16.msra.mxu0 %v2130_v27 }
  0x60   :  { %604 = vmatprep.subr.bf16.mxu0 %v2135_v29  ;;  %644 = vmatpush1.bf16.msra.mxu1 %v2163_v32  ;;  %v2199_v29 = vld [vmem:[#allocation6 + $0xc0] ss:$16 sps:$4 sm:$0xff]   ;;  %v2207_v32 = vld [vmem:[#allocation6 + $0xa4] ss:$16 sps:$4 sm:$0xff]  }
  0x61   :  { %645 = vmatprep.subr.bf16.mxu1 %v2171_v34  ;;  %v2205_v34 = vld [vmem:[#allocation6 + $0xa0] ss:$16 sps:$4 sm:$0xff]  }
  0x63   :  { %605 = vmatpush1.bf16.msra.mxu0 %v2133_v31  ;;  %v2204_v31 = vld [vmem:[#allocation6 + $0xcc] ss:$16 sps:$4 sm:$0xff]  }
  0x64   :  { %606 = vmatprep.subr.bf16.mxu0 %v2138_v33  ;;  %646 = vmatpush1.bf16.msra.mxu1 %v2169_v36  ;;  %v2202_v33 = vld [vmem:[#allocation6 + $0xc8] ss:$16 sps:$4 sm:$0xff]   ;;  %v2213_v36 = vld [vmem:[#allocation6 + $0x84] ss:$16 sps:$4 sm:$0xff]  }
  0x65   :  { %647 = vmatprep.subr.bf16.mxu1 %v2177_v38  ;;  %v2211_v38 = vld [vmem:[#allocation6 + $0x80] ss:$16 sps:$4 sm:$0xff]  }
  0x67   :  { %607 = vmatpush1.bf16.msra.mxu0 %v2136_v35  ;;  %v2210_v35 = vld [vmem:[#allocation6 + $0xac] ss:$16 sps:$4 sm:$0xff]  }
  0x68   :  { %608 = vmatprep.subr.bf16.mxu0 %v2141_v37  ;;  %648 = vmatpush1.bf16.msra.mxu1 %v2175_v40  ;;  %v2208_v37 = vld [vmem:[#allocation6 + $0xa8] ss:$16 sps:$4 sm:$0xff]   ;;  %v2219_v40 = vld [vmem:[#allocation6 + $0x64] ss:$16 sps:$4 sm:$0xff]  }
  0x69   :  { %649 = vmatprep.subr.bf16.mxu1 %v2183_v42  ;;  %v2217_v42 = vld [vmem:[#allocation6 + $0x60] ss:$16 sps:$4 sm:$0xff]  }
  0x6b   :  { %609 = vmatpush1.bf16.msra.mxu0 %v2139_v39  ;;  %v2216_v39 = vld [vmem:[#allocation6 + $0x8c] ss:$16 sps:$4 sm:$0xff]  }
  0x6c   :  { %610 = vmatprep.subr.bf16.mxu0 %v2144_v41  ;;  %650 = vmatpush1.bf16.msra.mxu1 %v2181_v44  ;;  %v2214_v41 = vld [vmem:[#allocation6 + $0x88] ss:$16 sps:$4 sm:$0xff]   ;;  %v2225_v44 = vld [vmem:[#allocation6 + $0x44] ss:$16 sps:$4 sm:$0xff]  }
  0x6d   :  { %651 = vmatprep.subr.bf16.mxu1 %v2189_v58  ;;  %v2241_v58 = vld [vmem:[#allocation6 + $0x1e0] ss:$16 sps:$4 sm:$0xff]  }
  0x6f   :  { %611 = vmatpush1.bf16.msra.mxu0 %v2142_v43  ;;  %v2222_v43 = vld [vmem:[#allocation6 + $0x6c] ss:$16 sps:$4 sm:$0xff]  }
  0x70   :  { %612 = vmatprep.subr.bf16.mxu0 %v2150_v45  ;;  %652 = vmatpush1.bf16.msra.mxu1 %v2187_v60  ;;  %v2220_v45 = vld [vmem:[#allocation6 + $0x68] ss:$16 sps:$4 sm:$0xff]   ;;  %v2249_v60 = vld [vmem:[#allocation6 + $0x1c4] ss:$16 sps:$4 sm:$0xff]  }
  0x71   :  { %1088 = vmatprep.subr.bf16.mxu1 %v2195_v63  ;;  %v2252_v63 = vld [vmem:[#allocation6 + $0x1cc] ss:$16 sps:$4 sm:$0xff]  }
  0x73   :  { %613 = vmatpush2.bf16.msra.mxu0 %v2148_v46  ;;  %v2223_v46 = vld [vmem:[#allocation6 + $0x40] ss:$16 sps:$4 sm:$0xff]  }
  0x74   :  { %614 = vmatprep.subr.bf16.mxu0 %v2156_v47  ;;  %v2228_v47 = vld [vmem:[#allocation6 + $0x4c] ss:$16 sps:$4 sm:$0xff]  }
  0x77   :  { %615 = vmatpush2.bf16.msra.mxu0 %v2154_v48  ;;  %v2231_v48 = vld [vmem:[#allocation6 + $0x24] ss:$16 sps:$4 sm:$0xff]  }
  0x78   :  { %616 = vmatprep.subr.bf16.mxu0 %v2162_v49  ;;  %v2226_v49 = vld [vmem:[#allocation6 + $0x48] ss:$16 sps:$4 sm:$0xff]  }
  0x7b   :  { %617 = vmatpush2.bf16.msra.mxu0 %v2160_v50  ;;  %v2229_v50 = vld [vmem:[#allocation6 + $0x20] ss:$16 sps:$4 sm:$0xff]  }
  0x7c   :  { %618 = vmatprep.subr.bf16.mxu0 %v2168_v51  ;;  %v2234_v51 = vld [vmem:[#allocation6 + $0x2c] ss:$16 sps:$4 sm:$0xff]  }
  0x7f   :  { %619 = vmatpush2.bf16.msra.mxu0 %v2166_v52  ;;  %v2237_v52 = vld [vmem:[#allocation6 + $0x4] ss:$16 sps:$4 sm:$0xff]  }
  0x80   :  { %620 = vmatprep.subr.bf16.mxu0 %v2174_v53  ;;  %v2232_v53 = vld [vmem:[#allocation6 + $0x28] ss:$16 sps:$4 sm:$0xff]  }
  0x83   :  { %621 = vmatpush2.bf16.msra.mxu0 %v2172_v54  ;;  %v2235_v54 = vld [vmem:[#allocation6] ss:$16 sps:$4 sm:$0xff]  }
  0x84   :  { %622 = vmatprep.subr.bf16.mxu0 %v2180_v55  ;;  %v2240_v55 = vld [vmem:[#allocation6 + $0xc] ss:$16 sps:$4 sm:$0xff]  }
  0x87   :  { %623 = vmatpush2.bf16.msra.mxu0 %v2178_v56  ;;  %v2243_v56 = vld [vmem:[#allocation6 + $0x1e4] ss:$16 sps:$4 sm:$0xff]  }
  0x88   :  { %624 = vmatprep.subr.bf16.mxu0 %v2186_v57  ;;  %v2238_v57 = vld [vmem:[#allocation6 + $0x8] ss:$16 sps:$4 sm:$0xff]  }
  0x8b   :  { %625 = vmatpush2.bf16.msra.mxu0 %v2184_v59  ;;  %v2246_v59 = vld [vmem:[#allocation6 + $0x1ec] ss:$16 sps:$4 sm:$0xff]  }
  0x8c   :  { %626 = vmatprep.subr.bf16.mxu0 %v2192_v61  ;;  %v2244_v61 = vld [vmem:[#allocation6 + $0x1e8] ss:$16 sps:$4 sm:$0xff]  }
  0x8f   :  { %627 = vmatpush2.bf16.msra.mxu0 %v2190_v62  ;;  %v2247_v62 = vld [vmem:[#allocation6 + $0x1c0] ss:$16 sps:$4 sm:$0xff]  }
  0x90   :  { %1129 = vmatprep.subr.bf16.mxu0 %v2198_v0  ;;  %v2255_v0 = vld [vmem:[#allocation6 + $0x1a4] ss:$16 sps:$4 sm:$0xff]  }
 0x112   :  { %v284_v9 = vpop.f32.mrf.mxu1  ;;  %v243_v12 = vpop.f32.mrf.mxu0 }
 0x113   :  { %v285_v11 = vadd.f32 %v284_v9, %v137_v7  ;;  %v244_v13 = vadd.f32 %v243_v12, %v129_v8  ;;  %v2258_v7 = vld [vmem:[#allocation6 + $0x1ac] ss:$16 sps:$4 sm:$0xff]   ;;  %v2261_v8 = vld [vmem:[#allocation6 + $0x184] ss:$16 sps:$4 sm:$0xff]   ;;  %v2256_v9 = vld [vmem:[#allocation6 + $0x1a8] ss:$16 sps:$4 sm:$0xff]  }
 0x114   :  { %v2087_v14 = vpop.f32.mrf.mxu1  ;;  %v245_v16 = vpop.f32.mrf.mxu0  ;;  %v2262_v12 = vld [vmem:[#allocation6 + $0x188] ss:$16 sps:$4 sm:$0xff]  }
 0x115   :  { %v292_v15 = vmax.f32 %v285_v11, 0.0  ;;  %v246_v17 = vadd.f32 %v245_v16, %v133_v10  ;;  %v290_v21 = vmax.f32 %v244_v13, 0.0  ;;  %v2259_v10 = vld [vmem:[#allocation6 + $0x180] ss:$16 sps:$4 sm:$0xff]   ;;  %v2264_v11 = vld [vmem:[#allocation6 + $0x18c] ss:$16 sps:$4 sm:$0xff]  }
 0x116   :  { %v287_v18 = vpop.f32.mrf.mxu1  ;;  %v247_v22 = vpop.f32.mrf.mxu0  ;;  %v2267_v13 = vld [vmem:[#allocation6 + $0x164] ss:$16 sps:$4 sm:$0xff]   ;;  %v2270_v14 = vld [vmem:[#allocation6 + $0x16c] ss:$16 sps:$4 sm:$0xff]   ;;  %v2268_v16 = vld [vmem:[#allocation6 + $0x168] ss:$16 sps:$4 sm:$0xff]  }
 0x117   :  { %v295_v20 = vpack.c.bf16 %v292_v15, %v292_v15  ;;  %v291_v24 = vmax.f32 %v246_v17, 0.0  ;;  %v293_v30 = vpack.c.bf16 %v290_v21, %v290_v21  ;;  %v2265_v15 = vld [vmem:[#allocation6 + $0x160] ss:$16 sps:$4 sm:$0xff]   ;;  %v2273_v17 = vld [vmem:[#allocation6 + $0x144] ss:$16 sps:$4 sm:$0xff]  }
 0x118   :  { %v2088_v25 = vpop.f32.mrf.mxu1  ;;  %v248_v26 = vpop.f32.mrf.mxu0  ;;  %v2276_v18 = vld [vmem:[#allocation6 + $0x14c] ss:$16 sps:$4 sm:$0xff]   ;;  %v2279_v21 = vld [vmem:[#allocation6 + $0x124] ss:$16 sps:$4 sm:$0xff]  }
 0x119   :  { %670 = vmatmul.mubr.bf16.vlgmr.msra.gmra.mxu1 %v295_v20  ;;  %v294_v27 = vpack.c.bf16 %v291_v24, %v291_v24  ;;  %v2274_v20 = vld [vmem:[#allocation6 + $0x148] ss:$16 sps:$4 sm:$0xff]   ;;  %v2282_v22 = vld [vmem:[#allocation6 + $0x12c] ss:$16 sps:$4 sm:$0xff]   ;;  %v2285_v25 = vld [vmem:[#allocation6 + $0x104] ss:$16 sps:$4 sm:$0xff]  }
 0x11a   :  { %1089 = vmatpush1.bf16.msra.mxu1 %v2193_v19  ;;  %v2271_v19 = vld [vmem:[#allocation6 + $0x140] ss:$16 sps:$4 sm:$0xff]   ;;  %v2280_v24 = vld [vmem:[#allocation6 + $0x128] ss:$16 sps:$4 sm:$0xff]   ;;  %v2288_v26 = vld [vmem:[#allocation6 + $0x10c] ss:$16 sps:$4 sm:$0xff]  }
 0x11b   :  { %1090 = vmatprep.subr.bf16.mxu1 %v2201_v23  ;;  %628 = vmatprep.mubr.bf16.mxu0 %v294_v27  ;;  %v2277_v23 = vld [vmem:[#allocation6 + $0x120] ss:$16 sps:$4 sm:$0xff]  }
 0x11c   :  { %629 = vmatmul.mubr.bf16.vlgmr.msra.gmra.mxu0 %v293_v30  ;;  %v2283_v27 = vld [vmem:[#allocation6 + $0x100] ss:$16 sps:$4 sm:$0xff]   ;;  %v2294_v30 = vld [vmem:[#allocation7 + $0x174] ss:$8 sps:$4 sm:$0xff]  }
 0x11d   :  { %1130 = vmatpush1.bf16.msra.mxu0 %v2196_v28  ;;  %v2286_v28 = vld [vmem:[#allocation6 + $0x108] ss:$16 sps:$4 sm:$0xff]  }
 0x11e   :  { %1091 = vmatpush1.bf16.msra.mxu1 %v2199_v29  ;;  %1131 = vmatprep.subr.bf16.mxu0 %v2204_v31  ;;  %v2291_v29 = vld [vmem:[#allocation7 + $0x74] ss:$8 sps:$4 sm:$0xff]   ;;  %v344_v31 = vld [vmem:[%s2645_s4] sm:$0x3] }
 0x11f   :  { %1092 = vmatprep.subr.bf16.mxu1 %v2207_v32 }
 0x121   :  { %1132 = vmatpush1.bf16.msra.mxu0 %v2202_v33  ;;  %v349_v33 = vrot.slane %v344_v31, %v2608_v5 }
 0x122   :  { %1093 = vmatpush1.bf16.msra.mxu1 %v2205_v34  ;;  %1133 = vmatprep.subr.bf16.mxu0 %v2210_v35  ;;  %v353_v35 = vrot.slane %v344_v31, %v2611_v6  ;;  %v2352_v31 = vld [vmem:[#allocation7 + $0x1d0] ss:$8 sps:$4 sm:$0xff]  }
 0x123   :  { %1094 = vmatprep.subr.bf16.mxu1 %v2213_v36 }
 0x125   :  { %1134 = vmatpush1.bf16.msra.mxu0 %v2208_v37 }
 0x126   :  { %1095 = vmatpush1.bf16.msra.mxu1 %v2211_v38  ;;  %1135 = vmatprep.subr.bf16.mxu0 %v2216_v39 }
 0x127   :  { %1096 = vmatprep.subr.bf16.mxu1 %v2219_v40 }
 0x129   :  { %1136 = vmatpush1.bf16.msra.mxu0 %v2214_v41 }
 0x12a   :  { %1097 = vmatpush1.bf16.msra.mxu1 %v2217_v42  ;;  %1137 = vmatprep.subr.bf16.mxu0 %v2222_v43 }
 0x12b   :  { %1098 = vmatprep.subr.bf16.mxu1 %v2225_v44 }
 0x12d   :  { %1138 = vmatpush1.bf16.msra.mxu0 %v2220_v45 }
 0x12e   :  { %1099 = vmatpush1.bf16.msra.mxu1 %v2223_v46  ;;  %1139 = vmatprep.subr.bf16.mxu0 %v2228_v47 }
 0x12f   :  { %1100 = vmatprep.subr.bf16.mxu1 %v2231_v48 }
 0x131   :  { %1140 = vmatpush1.bf16.msra.mxu0 %v2226_v49  ;;  %v2289_v49 = vld [vmem:[#allocation7 + $0x70] ss:$8 sps:$4 sm:$0xff]  }
 0x132   :  { %1101 = vmatpush1.bf16.msra.mxu1 %v2229_v50  ;;  %1141 = vmatprep.subr.bf16.mxu0 %v2234_v51  ;;  %v2292_v50 = vld [vmem:[#allocation7 + $0x170] ss:$8 sps:$4 sm:$0xff]  }
 0x133   :  { %1102 = vmatprep.subr.bf16.mxu1 %v2237_v52  ;;  %v2297_v52 = vld [vmem:[#allocation7 + $0x64] ss:$8 sps:$4 sm:$0xff]  }
 0x135   :  { %1142 = vmatpush1.bf16.msra.mxu0 %v2232_v53  ;;  %v2300_v53 = vld [vmem:[#allocation7 + $0x164] ss:$8 sps:$4 sm:$0xff]  }
 0x136   :  { %1103 = vmatpush1.bf16.msra.mxu1 %v2235_v54  ;;  %1143 = vmatprep.subr.bf16.mxu0 %v2240_v55  ;;  %v2295_v54 = vld [vmem:[#allocation7 + $0x60] ss:$8 sps:$4 sm:$0xff]  }
 0x137   :  { %1104 = vmatprep.subr.bf16.mxu1 %v2243_v56  ;;  %v2298_v55 = vld [vmem:[#allocation7 + $0x160] ss:$8 sps:$4 sm:$0xff]   ;;  %v2303_v56 = vld [vmem:[#allocation7 + $0x54] ss:$8 sps:$4 sm:$0xff]  }
 0x139   :  { %1144 = vmatpush1.bf16.msra.mxu0 %v2238_v57  ;;  %v2306_v57 = vld [vmem:[#allocation7 + $0x154] ss:$8 sps:$4 sm:$0xff]  }
 0x13a   :  { %1105 = vmatpush2.bf16.msra.mxu1 %v2241_v58  ;;  %1145 = vmatprep.subr.bf16.mxu0 %v2246_v59  ;;  %v2301_v58 = vld [vmem:[#allocation7 + $0x50] ss:$8 sps:$4 sm:$0xff]  }
 0x13b   :  { %1106 = vmatprep.subr.bf16.mxu1 %v2249_v60  ;;  %v2304_v59 = vld [vmem:[#allocation7 + $0x150] ss:$8 sps:$4 sm:$0xff]   ;;  %v2309_v60 = vld [vmem:[#allocation7 + $0x44] ss:$8 sps:$4 sm:$0xff]  }
 0x13d   :  { %1146 = vmatpush2.bf16.msra.mxu0 %v2244_v61  ;;  %v2312_v61 = vld [vmem:[#allocation7 + $0x144] ss:$8 sps:$4 sm:$0xff]  }
 0x13e   :  { %1107 = vmatpush2.bf16.msra.mxu1 %v2247_v62  ;;  %1147 = vmatprep.subr.bf16.mxu0 %v2252_v63  ;;  %v2307_v62 = vld [vmem:[#allocation7 + $0x40] ss:$8 sps:$4 sm:$0xff]  }
 0x13f   :  { %1108 = vmatprep.subr.bf16.mxu1 %v2255_v0  ;;  %v2310_v63 = vld [vmem:[#allocation7 + $0x140] ss:$8 sps:$4 sm:$0xff]   ;;  %v2315_v0 = vld [vmem:[#allocation7 + $0x34] ss:$8 sps:$4 sm:$0xff]  }
 0x141   :  { %1148 = vmatpush2.bf16.msra.mxu0 %v2250_v1  ;;  %v2318_v1 = vld [vmem:[#allocation7 + $0x134] ss:$8 sps:$4 sm:$0xff]  }
 0x142   :  { %1109 = vmatpush2.bf16.msra.mxu1 %v2253_v4  ;;  %1149 = vmatprep.subr.bf16.mxu0 %v2258_v7  ;;  %v2313_v4 = vld [vmem:[#allocation7 + $0x30] ss:$8 sps:$4 sm:$0xff]  }
 0x143   :  { %1110 = vmatprep.subr.bf16.mxu1 %v2261_v8  ;;  %v2316_v7 = vld [vmem:[#allocation7 + $0x130] ss:$8 sps:$4 sm:$0xff]   ;;  %v2321_v8 = vld [vmem:[#allocation7 + $0x24] ss:$8 sps:$4 sm:$0xff]  }
 0x145   :  { %1150 = vmatpush2.bf16.msra.mxu0 %v2256_v9  ;;  %v2324_v9 = vld [vmem:[#allocation7 + $0x124] ss:$8 sps:$4 sm:$0xff]  }
 0x146   :  { %1111 = vmatpush2.bf16.msra.mxu1 %v2259_v10  ;;  %1151 = vmatprep.subr.bf16.mxu0 %v2264_v11  ;;  %v2319_v10 = vld [vmem:[#allocation7 + $0x20] ss:$8 sps:$4 sm:$0xff]  }
 0x147   :  { %1112 = vmatprep.subr.bf16.mxu1 %v2267_v13  ;;  %v2322_v11 = vld [vmem:[#allocation7 + $0x120] ss:$8 sps:$4 sm:$0xff]   ;;  %v2330_v13 = vld [vmem:[#allocation7 + $0x114] ss:$8 sps:$4 sm:$0xff]  }
 0x149   :  { %1152 = vmatpush2.bf16.msra.mxu0 %v2262_v12  ;;  %v2327_v12 = vld [vmem:[#allocation7 + $0x14] ss:$8 sps:$4 sm:$0xff]  }
 0x14a   :  { %1153 = vmatprep.subr.bf16.mxu0 %v2270_v14  ;;  %1113 = vmatpush2.bf16.msra.mxu1 %v2265_v15  ;;  %v2325_v14 = vld [vmem:[#allocation7 + $0x10] ss:$8 sps:$4 sm:$0xff]  }
 0x14b   :  { %1114 = vmatprep.subr.bf16.mxu1 %v2273_v17  ;;  %v2328_v15 = vld [vmem:[#allocation7 + $0x110] ss:$8 sps:$4 sm:$0xff]   ;;  %v2336_v17 = vld [vmem:[#allocation7 + $0x104] ss:$8 sps:$4 sm:$0xff]  }
 0x14d   :  { %1154 = vmatpush2.bf16.msra.mxu0 %v2268_v16  ;;  %v2333_v16 = vld [vmem:[#allocation7 + $0x4] ss:$8 sps:$4 sm:$0xff]  }
 0x14e   :  { %1155 = vmatprep.subr.bf16.mxu0 %v2276_v18  ;;  %1115 = vmatpush2.bf16.msra.mxu1 %v2271_v19  ;;  %v2331_v18 = vld [vmem:[#allocation7] ss:$8 sps:$4 sm:$0xff]  }
 0x14f   :  { %1116 = vmatprep.subr.bf16.mxu1 %v2279_v21  ;;  %v2334_v19 = vld [vmem:[#allocation7 + $0x100] ss:$8 sps:$4 sm:$0xff]   ;;  %v2342_v21 = vld [vmem:[#allocation7 + $0x1f4] ss:$8 sps:$4 sm:$0xff]  }
 0x151   :  { %1156 = vmatpush2.bf16.msra.mxu0 %v2274_v20  ;;  %v2339_v20 = vld [vmem:[#allocation7 + $0xf4] ss:$8 sps:$4 sm:$0xff]  }
 0x152   :  { %1157 = vmatprep.subr.bf16.mxu0 %v2282_v22  ;;  %1117 = vmatpush2.bf16.msra.mxu1 %v2277_v23  ;;  %v2337_v22 = vld [vmem:[#allocation7 + $0xf0] ss:$8 sps:$4 sm:$0xff]  }
 0x153   :  { %1118 = vmatprep.subr.bf16.mxu1 %v2285_v25  ;;  %v2340_v23 = vld [vmem:[#allocation7 + $0x1f0] ss:$8 sps:$4 sm:$0xff]   ;;  %v2348_v25 = vld [vmem:[#allocation7 + $0x1e4] ss:$8 sps:$4 sm:$0xff]  }
 0x155   :  { %1158 = vmatpush2.bf16.msra.mxu0 %v2280_v24  ;;  %v2345_v24 = vld [vmem:[#allocation7 + $0xe4] ss:$8 sps:$4 sm:$0xff]  }
 0x156   :  { %1159 = vmatprep.subr.bf16.mxu0 %v2288_v26  ;;  %1119 = vmatpush2.bf16.msra.mxu1 %v2283_v27  ;;  %v2343_v26 = vld [vmem:[#allocation7 + $0xe0] ss:$8 sps:$4 sm:$0xff]  }
 0x157   :  { %1574 = vmatprep.subr.bf16.mxu1 %v2291_v29  ;;  %v2346_v27 = vld [vmem:[#allocation7 + $0x1e0] ss:$8 sps:$4 sm:$0xff]   ;;  %v2354_v29 = vld [vmem:[#allocation7 + $0x1d4] ss:$8 sps:$4 sm:$0xff]  }
 0x159   :  { %1160 = vmatpush2.bf16.msra.mxu0 %v2286_v28  ;;  %v2351_v28 = vld [vmem:[#allocation7 + $0xd4] ss:$8 sps:$4 sm:$0xff]  }
 0x15a   :  { %1615 = vmatprep.subr.bf16.mxu0 %v2294_v30  ;;  %v2349_v30 = vld [vmem:[#allocation7 + $0xd0] ss:$8 sps:$4 sm:$0xff]  }
 0x1d9   :  { %v671_v32 = vpop.f32.mrf.mxu1 }
 0x1db   :  { %v673_v34 = vpop.f32.mrf.mxu1 }
 0x1dc   :  { %v630_v36 = vpop.f32.mrf.mxu0 }
 0x1dd   :  { %v675_v37 = vpop.f32.mrf.mxu1  ;;  %v631_v38 = vadd.f32 %v630_v36, %v349_v33  ;;  %v2360_v33 = vld [vmem:[#allocation7 + $0x1c4] ss:$8 sps:$4 sm:$0xff]   ;;  %v2363_v36 = vld [vmem:[#allocation7 + $0xb4] ss:$8 sps:$4 sm:$0xff]  }
 0x1de   :  { %v632_v39 = vpop.f32.mrf.mxu0  ;;  %v2366_v37 = vld [vmem:[#allocation7 + $0x1b4] ss:$8 sps:$4 sm:$0xff]  }
 0x1df   :  { %v676_v40 = vpop.f32.mrf.mxu1  ;;  %v672_v41 = vadd.f32 %v671_v32, %v631_v38  ;;  %v633_v42 = vadd.f32 %v632_v39, %v353_v35  ;;  %v2357_v32 = vld [vmem:[#allocation7 + $0xc4] ss:$8 sps:$4 sm:$0xff]   ;;  %v2358_v35 = vld [vmem:[#allocation7 + $0x1c0] ss:$8 sps:$4 sm:$0xff]   ;;  %v2361_v38 = vld [vmem:[#allocation7 + $0xb0] ss:$8 sps:$4 sm:$0xff]  }
 0x1e0   :  { %v634_v43 = vpop.f32.mrf.mxu0  ;;  %v2364_v39 = vld [vmem:[#allocation7 + $0x1b0] ss:$8 sps:$4 sm:$0xff]   ;;  %v2369_v40 = vld [vmem:[#allocation7 + $0xa4] ss:$8 sps:$4 sm:$0xff]  }
 0x1e1   :  { %v674_v44 = vadd.f32 %v673_v34, %v633_v42  ;;  %v678_v45 = vmax.f32 %v672_v41, 0.0  ;;  %v2355_v34 = vld [vmem:[#allocation7 + $0xc0] ss:$8 sps:$4 sm:$0xff]   ;;  %v2372_v41 = vld [vmem:[#allocation7 + $0x1a4] ss:$8 sps:$4 sm:$0xff]  }
 0x1e2   :  { %v635_v46 = vpop.f32.mrf.mxu0  ;;  %v2367_v42 = vld [vmem:[#allocation7 + $0xa0] ss:$8 sps:$4 sm:$0xff]  }
 0x1e3   :  { %v679_v47 = vmax.f32 %v674_v44, 0.0  ;;  %v680_v51 = vpack.c.bf16 %v678_v45, %v678_v45  ;;  %v2370_v43 = vld [vmem:[#allocation7 + $0x1a0] ss:$8 sps:$4 sm:$0xff]   ;;  %v2375_v44 = vld [vmem:[#allocation7 + $0x94] ss:$8 sps:$4 sm:$0xff]  }
 0x1e4   :  { %v2378_v45 = vld [vmem:[#allocation7 + $0x194] ss:$8 sps:$4 sm:$0xff]   ;;  %v2373_v46 = vld [vmem:[#allocation7 + $0x90] ss:$8 sps:$4 sm:$0xff]  }
 0x1e5   :  { %v681_v48 = vpack.c.bf16 %v679_v47, %v679_v47  ;;  %v2376_v47 = vld [vmem:[#allocation7 + $0x190] ss:$8 sps:$4 sm:$0xff]  }
 0x1e7   :  { %1120 = vmatprep.mubr.bf16.mxu1 %v681_v48  ;;  %1161 = vmatprep.mubr.bf16.mxu0 %v681_v48  ;;  %v2381_v48 = vld [vmem:[#allocation7 + $0x84] ss:$8 sps:$4 sm:$0xff]  }
 0x1e8   :  { %1121 = vmatmul.mubr.bf16.vlgmr.msra.gmra.mxu1 %v680_v51  ;;  %1162 = vmatmul.mubr.bf16.vlgmr.msra.gmra.mxu0 %v680_v51  ;;  %v2382_v51 = vld [vmem:[#allocation7 + $0x180] ss:$8 sps:$4 sm:$0xff]  }
 0x1e9   :  { %1575 = vmatpush1.bf16.msra.mxu1 %v2289_v49  ;;  %1616 = vmatpush1.bf16.msra.mxu0 %v2292_v50  ;;  %v2384_v49 = vld [vmem:[#allocation7 + $0x184] ss:$8 sps:$4 sm:$0xff]   ;;  %v2379_v50 = vld [vmem:[#allocation7 + $0x80] ss:$8 sps:$4 sm:$0xff]  }
 0x1ea   :  { %1576 = vmatprep.subr.bf16.mxu1 %v2297_v52  ;;  %1617 = vmatprep.subr.bf16.mxu0 %v2300_v53  ;;  %v2385_v52 = vld [vmem:[#allocation9 + $0x78] sm:$0xff]   ;;  %v746_v53 = vld [vmem:[%s2647_s6] sm:$0xf] }
 0x1ed   :  { %1577 = vmatpush1.bf16.msra.mxu1 %v2295_v54  ;;  %1618 = vmatpush1.bf16.msra.mxu0 %v2298_v55  ;;  %v762_v54 = vsub.s32 3, %v2601_v2  ;;  %v751_v55 = vrot.slane %v746_v53, %v2608_v5 }
 0x1ee   :  { %1578 = vmatprep.subr.bf16.mxu1 %v2303_v56  ;;  %1619 = vmatprep.subr.bf16.mxu0 %v2306_v57  ;;  %v759_v56 = vrot.slane %v746_v53, %v136_v3  ;;  %v755_v57 = vrot.slane %v746_v53, %v2611_v6 }
 0x1f1   :  { %1579 = vmatpush1.bf16.msra.mxu1 %v2301_v58  ;;  %1620 = vmatpush1.bf16.msra.mxu0 %v2304_v59  ;;  %v763_v58 = vrot.slane %v746_v53, %v762_v54 }
 0x1f2   :  { %1580 = vmatprep.subr.bf16.mxu1 %v2309_v60  ;;  %1621 = vmatprep.subr.bf16.mxu0 %v2312_v61 }
 0x1f5   :  { %1581 = vmatpush1.bf16.msra.mxu1 %v2307_v62  ;;  %1622 = vmatpush1.bf16.msra.mxu0 %v2310_v63 }
 0x1f6   :  { %1582 = vmatprep.subr.bf16.mxu1 %v2315_v0  ;;  %1623 = vmatprep.subr.bf16.mxu0 %v2318_v1 }
 0x1f9   :  { %1583 = vmatpush1.bf16.msra.mxu1 %v2313_v4  ;;  %1624 = vmatpush1.bf16.msra.mxu0 %v2316_v7 }
 0x1fa   :  { %1584 = vmatprep.subr.bf16.mxu1 %v2321_v8  ;;  %1625 = vmatprep.subr.bf16.mxu0 %v2324_v9 }
 0x1fd   :  { %1585 = vmatpush1.bf16.msra.mxu1 %v2319_v10  ;;  %1626 = vmatpush1.bf16.msra.mxu0 %v2322_v11 }
 0x1fe   :  { %1586 = vmatprep.subr.bf16.mxu1 %v2327_v12  ;;  %1627 = vmatprep.subr.bf16.mxu0 %v2330_v13 }
 0x201   :  { %1587 = vmatpush1.bf16.msra.mxu1 %v2325_v14  ;;  %1628 = vmatpush1.bf16.msra.mxu0 %v2328_v15  ;;  %v2386_v15 = vld [vmem:[#allocation9 + $0x38] sm:$0xff]  }
 0x202   :  { %1588 = vmatprep.subr.bf16.mxu1 %v2333_v16  ;;  %1629 = vmatprep.subr.bf16.mxu0 %v2336_v17 }
 0x205   :  { %1589 = vmatpush1.bf16.msra.mxu1 %v2331_v18  ;;  %1630 = vmatpush1.bf16.msra.mxu0 %v2334_v19  ;;  %v2387_v18 = vld [vmem:[#allocation9 + $0x70] sm:$0xff]  }
 0x206   :  { %1590 = vmatprep.subr.bf16.mxu1 %v2339_v20  ;;  %1631 = vmatprep.subr.bf16.mxu0 %v2342_v21  ;;  %v2388_v19 = vld [vmem:[#allocation9 + $0x30] sm:$0xff]   ;;  %v2389_v20 = vld [vmem:[#allocation9 + $0x68] sm:$0xff]  }
 0x207   :  { %v2390_v21 = vld [vmem:[#allocation9 + $0x28] sm:$0xff]  }
 0x209   :  { %1591 = vmatpush2.bf16.msra.mxu1 %v2337_v22  ;;  %1632 = vmatpush2.bf16.msra.mxu0 %v2340_v23  ;;  %v2391_v22 = vld [vmem:[#allocation9 + $0x60] sm:$0xff]  }
 0x20a   :  { %1592 = vmatprep.subr.bf16.mxu1 %v2345_v24  ;;  %1633 = vmatprep.subr.bf16.mxu0 %v2348_v25  ;;  %v2392_v23 = vld [vmem:[#allocation9 + $0x20] sm:$0xff]   ;;  %v2393_v24 = vld [vmem:[#allocation9 + $0x58] sm:$0xff]  }
 0x20b   :  { %v2394_v25 = vld [vmem:[#allocation9 + $0x18] sm:$0xff]  }
 0x20d   :  { %1593 = vmatpush2.bf16.msra.mxu1 %v2343_v26  ;;  %1634 = vmatpush2.bf16.msra.mxu0 %v2346_v27  ;;  %v2395_v26 = vld [vmem:[#allocation9 + $0x50] sm:$0xff]  }
 0x20e   :  { %1594 = vmatprep.subr.bf16.mxu1 %v2351_v28  ;;  %1635 = vmatprep.subr.bf16.mxu0 %v2354_v29  ;;  %v2396_v27 = vld [vmem:[#allocation9 + $0x10] sm:$0xff]   ;;  %v2397_v28 = vld [vmem:[#allocation9 + $0x48] sm:$0xff]  }
 0x20f   :  { %v2398_v29 = vld [vmem:[#allocation9 + $0x8] sm:$0xff]  }
 0x211   :  { %1595 = vmatpush2.bf16.msra.mxu1 %v2349_v30  ;;  %1636 = vmatpush2.bf16.msra.mxu0 %v2352_v31  ;;  %v2399_v30 = vld [vmem:[#allocation9 + $0x40] sm:$0xff]  }
 0x212   :  { %1596 = vmatprep.subr.bf16.mxu1 %v2357_v32  ;;  %1637 = vmatprep.subr.bf16.mxu0 %v2360_v33  ;;  %v2400_v31 = vld [vmem:[#allocation9] sm:$0xff]  }
 0x213   :  { %v1242_v32 = vld [vmem:[%s2649_s8] sm:$0x3] }
 0x214   :  { %v1247_v33 = vrot.slane %v1242_v32, %v2608_v5 }
 0x215   :  { %1597 = vmatpush2.bf16.msra.mxu1 %v2355_v34  ;;  %1638 = vmatpush2.bf16.msra.mxu0 %v2358_v35  ;;  %v1251_v34 = vrot.slane %v1242_v32, %v2611_v6  ;;  %v2033_v6 = vld [vmem:[%s2651_s10] ss:$0 sm:$0xff] }
 0x216   :  { %1598 = vmatprep.subr.bf16.mxu1 %v2363_v36  ;;  %1639 = vmatprep.subr.bf16.mxu0 %v2366_v37 }
 0x219   :  { %1599 = vmatpush2.bf16.msra.mxu1 %v2361_v38  ;;  %1640 = vmatpush2.bf16.msra.mxu0 %v2364_v39 }
 0x21a   :  { %1600 = vmatprep.subr.bf16.mxu1 %v2369_v40  ;;  %1641 = vmatprep.subr.bf16.mxu0 %v2372_v41 }
 0x21d   :  { %1601 = vmatpush2.bf16.msra.mxu1 %v2367_v42  ;;  %1642 = vmatpush2.bf16.msra.mxu0 %v2370_v43 }
 0x21e   :  { %1602 = vmatprep.subr.bf16.mxu1 %v2375_v44  ;;  %1643 = vmatprep.subr.bf16.mxu0 %v2378_v45 }
 0x221   :  { %1603 = vmatpush2.bf16.msra.mxu1 %v2373_v46  ;;  %1644 = vmatpush2.bf16.msra.mxu0 %v2376_v47 }
 0x222   :  { %1604 = vmatprep.subr.bf16.mxu1 %v2381_v48  ;;  %1645 = vmatprep.subr.bf16.mxu0 %v2384_v49 }
 0x225   :  { %1605 = vmatpush2.bf16.msra.mxu1 %v2379_v50  ;;  %1646 = vmatpush2.bf16.msra.mxu0 %v2382_v51 }
 0x226   :  { %2055 = vmatprep.subr.bf16.mxu1 %v2385_v52 }
 0x2a8   :  { %v1122_v59 = vpop.f32.mrf.mxu1  ;;  %v1163_v60 = vpop.f32.mrf.mxu0 }
 0x2a9   :  { %v1123_v61 = vadd.f32 %v1122_v59, %v751_v55  ;;  %v1164_v62 = vadd.f32 %v1163_v60, %v759_v56 }
 0x2aa   :  { %v1124_v63 = vpop.f32.mrf.mxu1  ;;  %v1165_v0 = vpop.f32.mrf.mxu0 }
 0x2ab   :  { %v1125_v1 = vadd.f32 %v1124_v63, %v755_v57  ;;  %v1166_v4 = vadd.f32 %v1165_v0, %v763_v58  ;;  %v1170_v7 = vmax.f32 %v1123_v61, 0.0  ;;  %v1172_v8 = vmax.f32 %v1164_v62, 0.0 }
 0x2ac   :  { %v1126_v9 = vpop.f32.mrf.mxu1  ;;  %v1167_v10 = vpop.f32.mrf.mxu0 }
 0x2ad   :  { %v1171_v11 = vmax.f32 %v1125_v1, 0.0  ;;  %v1173_v12 = vmax.f32 %v1166_v4, 0.0  ;;  %v1174_v16 = vpack.c.bf16 %v1170_v7, %v1170_v7  ;;  %v1176_v17 = vpack.c.bf16 %v1172_v8, %v1172_v8 }
 0x2ae   :  { %v1127_v13 = vpop.f32.mrf.mxu1  ;;  %v1168_v2 = vpop.f32.mrf.mxu0 }
 0x2af   :  { %v1175_v3 = vpack.c.bf16 %v1171_v11, %v1171_v11  ;;  %v1177_v14 = vpack.c.bf16 %v1173_v12, %v1173_v12 }
 0x2b1   :  { %1606 = vmatprep.mubr.bf16.mxu1 %v1175_v3  ;;  %1647 = vmatprep.mubr.bf16.mxu0 %v1177_v14 }
 0x2b2   :  { %1607 = vmatmul.mubr.bf16.vlgmr.msra.gmra.mxu1 %v1174_v16  ;;  %1648 = vmatmul.mubr.bf16.vlgmr.msra.gmra.mxu0 %v1176_v17 }
 0x2b3   :  { %2056 = vmatpush3.bf16.msra.mxu1 %v2386_v15 }
 0x2b4   :  { %2057 = vmatprep.subr.bf16.mxu1 %v2387_v18 }
 0x2b7   :  { %2058 = vmatpush3.bf16.msra.mxu1 %v2388_v19 }
 0x2b8   :  { %2059 = vmatprep.subr.bf16.mxu1 %v2389_v20 }
 0x2bb   :  { %2060 = vmatpush3.bf16.msra.mxu1 %v2390_v21 }
 0x2bc   :  { %2061 = vmatprep.subr.bf16.mxu1 %v2391_v22 }
 0x2bf   :  { %2062 = vmatpush3.bf16.msra.mxu1 %v2392_v23 }
 0x2c0   :  { %2063 = vmatprep.subr.bf16.mxu1 %v2393_v24 }
 0x2c3   :  { %2064 = vmatpush3.bf16.msra.mxu1 %v2394_v25 }
 0x2c4   :  { %2065 = vmatprep.subr.bf16.mxu1 %v2395_v26 }
 0x2c7   :  { %2066 = vmatpush3.bf16.msra.mxu1 %v2396_v27 }
 0x2c8   :  { %2067 = vmatprep.subr.bf16.mxu1 %v2397_v28 }
 0x2cb   :  { %2068 = vmatpush3.bf16.msra.mxu1 %v2398_v29 }
 0x2cc   :  { %2069 = vmatprep.subr.bf16.mxu1 %v2399_v30 }
 0x2cf   :  { %2070 = vmatpush3.bf16.msra.mxu1 %v2400_v31 }
 0x372   :  { %v1608_v35 = vpop.f32.mrf.mxu1  ;;  %v1649_v36 = vpop.f32.mrf.mxu0 }
 0x373   :  { %v1609_v37 = vadd.f32 %v1608_v35, %v1247_v33 }
 0x374   :  { %v1610_v38 = vpop.f32.mrf.mxu1  ;;  %v1651_v39 = vpop.f32.mrf.mxu0 }
 0x375   :  { %v1650_v40 = vadd.f32 %v1649_v36, %v1609_v37  ;;  %v1611_v41 = vadd.f32 %v1610_v38, %v1251_v34 }
 0x376   :  { %v1612_v42 = vpop.f32.mrf.mxu1  ;;  %v1653_v43 = vpop.f32.mrf.mxu0 }
 0x377   :  { %v1652_v44 = vadd.f32 %v1651_v39, %v1611_v41  ;;  %v1656_v45 = vmax.f32 %v1650_v40, 0.0 }
 0x378   :  { %v1613_v46 = vpop.f32.mrf.mxu1  ;;  %v1654_v47 = vpop.f32.mrf.mxu0 }
 0x379   :  { %v1657_v48 = vmax.f32 %v1652_v44, 0.0  ;;  %v1658_v50 = vpack.c.bf16 %v1656_v45, %v1656_v45 }
 0x37b   :  { %v1659_v49 = vpack.c.bf16 %v1657_v48, %v1657_v48 }
 0x37d   :  { %1827 = vmatprep.mubr.bf16.mxu1 %v1659_v49 }
 0x37e   :  { %1828 = vmatmul.mubr.bf16.vlgmr.msra.gmra.mxu1 %v1658_v50 }
 0x43e   :  { %v2071_v5 = vpop.f32.mrf.mxu1 }
 0x440   :  { %v2072_v51 = vpop.f32.mrf.mxu1 }
 0x441   :  { %v2073_v52 = vadd.f32 %v2072_v51, %v2071_v5 }
 0x442   :  { %v2074_v53 = vpop.f32.mrf.mxu1 }
 0x443   :  { %v1830_v54 = vadd.f32 %v2073_v52, %v2033_v6 }
 0x444   :  { %v2075_v55 = vpop.f32.mrf.mxu1 }
 0x445   :  { %1835 = vst [vmem:[%s2652_s11] sm:$0x3] %v1830_v54 }
 0x446   :  { %1840 = vsyncpa [#allocation3], 1 }
 0x447   :  { %1841 = vsyncpa [#allocation5], 1 }
 0x448   :  { %1842 = vsyncpa [#allocation8], 1 }

</bundles_post_ra>
